<compile_context>
chip_gen: v7x
topology: tpu7x:2x2x1
jax: 0.10.0
libtpu: 0.0.40
codegen_flags: <defaults>
</compile_context>

<pallas_src>
import functools

import jax
import jax.numpy as jnp
from jax import lax
from jax.experimental import pallas as pl
from jax.experimental.pallas import tpu as pltpu

BN_EPS = 1e-5
_VMEM_LIMIT = 32 * 1024 * 1024  # safe on v5e / v6e / v7x


def _round_up(a: int, b: int) -> int:
    return (a + b - 1) // b * b


# ---------------- Pass 1: conv GEMM + per-channel sum / sum-of-squares ----------------
def _conv_stats_kernel(patches_ref, w_ref, conv_ref, sum_ref, sumsq_ref):
    i = pl.program_id(0)

    # Conv-as-GEMM on the MXU (bf16 inputs, f32 accumulation).
    conv = jnp.dot(patches_ref[...], w_ref[...], preferred_element_type=jnp.float32)
    conv_ref[...] = conv

    # Per-channel reductions as (1, TILE_M) @ (TILE_M, Cpad) MXU dots rather than an
    # axis-0 cross-sublane (XLU) reduce.
    ones = jnp.ones((1, conv.shape[0]), jnp.float32)
    tile_sum = jnp.dot(ones, conv, preferred_element_type=jnp.float32)
    tile_sumsq = jnp.dot(ones, conv * conv, preferred_element_type=jnp.float32)

    @pl.when(i == 0)
    def _init():
        sum_ref[...] = jnp.zeros_like(sum_ref)
        sumsq_ref[...] = jnp.zeros_like(sumsq_ref)

    sum_ref[...] += tile_sum
    sumsq_ref[...] += tile_sumsq


# ---------------- Pass 2: BN (folded scale/shift) + GELU ----------------
def _bn_gelu_kernel(conv_ref, sum_ref, sumsq_ref, gamma_ref, beta_ref, o_ref,
                    *, inv_m, eps):
    mean = sum_ref[...] * inv_m                 # (1, Cpad); inv_m = 1/global_M
    ex2 = sumsq_ref[...] * inv_m
    var = jnp.maximum(ex2 - mean * mean, 0.0)   # guard tiny negative from cancellation
    inv_std = lax.rsqrt(var + eps)              # EUP rsqrt
    scale = gamma_ref[...] * inv_std            # (1, Cpad)
    shift = beta_ref[...] - mean * scale        # (1, Cpad)

    y = conv_ref[...] * scale + shift           # (TILE_M, Cpad), 2 VPU ops

    # GELU (tanh approximation).
    # TODO(synk): PyTorch nn.GELU() default is the exact erf formulation; the tanh
    # approximation (max abs diff ~3e-3) is used since erf lowering on Mosaic is not
    # guaranteed. Note the module names this "relu" but it is a GELU.
    c0 = 0.7978845608028654  # sqrt(2/pi)
    o_ref[...] = 0.5 * y * (1.0 + jnp.tanh(c0 * (y + 0.044715 * y * y * y)))


# ---------------- JAX glue ----------------
def _im2col_nhwc(x_nhwc, kh, kw, stride, pad, dil):
    """x_nhwc: (N,H,W,C) -> (N, Ho, Wo, kh*kw*C), K index = (i*kw + j)*C + c."""
    n, h, w, c = x_nhwc.shape
    xp = jnp.pad(x_nhwc, ((0, 0), (pad, pad), (pad, pad), (0, 0)))
    ho = (h + 2 * pad - dil * (kh - 1) - 1) // stride + 1
    wo = (w + 2 * pad - dil * (kw - 1) - 1) // stride + 1
    cols = []
    for i in range(kh):
        for j in range(kw):
            patch = xp[:,
                       i * dil: i * dil + stride * ho: stride,
                       j * dil: j * dil + stride * wo: stride,
                       :]
            cols.append(patch)
    return jnp.concatenate(cols, axis=-1), ho, wo


def cbr_forward(x_nchw, weight, bias, gamma, beta, *,
                stride=1, padding=1, dilation=1,
                tile_m=512, gemm_dtype=jnp.bfloat16, eps=BN_EPS):
    """x_nchw: (N, Cin, H, W); weight: (Cout, Cin, kh, kw); bias/gamma/beta: (Cout,).

    Returns NCHW output, matching Conv2d -> BatchNorm2d(training batch stats) -> GELU.
    `bias` is accepted for API parity but is not used: training-mode BN subtracts the
    per-channel mean, which cancels the conv bias exactly.
    """
    n, cin, h, w = x_nchw.shape
    cout, _, kh, kw = weight.shape

    x_nhwc = jnp.transpose(x_nchw, (0, 2, 3, 1)).astype(jnp.float32)
    patches, ho, wo = _im2col_nhwc(x_nhwc, kh, kw, stride, padding, dilation)

    m = n * ho * wo
    k = kh * kw * cin

    # Lane-dense padding: K and Cout up to multiples of 128; M up to a multiple of TILE_M.
    k_pad = _round_up(k, 128)
    c_pad = _round_up(cout, 128)
    tile_m = _round_up(min(tile_m, _round_up(m, 8)), 8)
    m_pad = _round_up(m, tile_m)
    num_tiles = m_pad // tile_m

    patches2d = patches.reshape(m, k)
    patches_p = jnp.pad(patches2d, ((0, m_pad - m), (0, k_pad - k))).astype(gemm_dtype)

    # Weight matrix matching the im2col K ordering: (kh, kw, Cin, Cout) -> (K, Cout),
    # zero-padded to (Kpad, Cpad).
    w_mat = jnp.transpose(weight, (2, 3, 1, 0)).reshape(k, cout).astype(jnp.float32)
    w_p = jnp.pad(w_mat, ((0, k_pad - k), (0, c_pad - cout))).astype(gemm_dtype)

    g_row = jnp.pad(gamma.reshape(1, cout).astype(jnp.float32), ((0, 0), (0, c_pad - cout)))
    bt_row = jnp.pad(beta.reshape(1, cout).astype(jnp.float32), ((0, 0), (0, c_pad - cout)))

    # ---- Pass 1: tiled conv GEMM + per-channel stats accumulation ----
    conv_out, ch_sum, ch_sumsq = pl.pallas_call(
        _conv_stats_kernel,
        out_shape=(
            jax.ShapeDtypeStruct((m_pad, c_pad), jnp.float32),
            jax.ShapeDtypeStruct((1, c_pad), jnp.float32),
            jax.ShapeDtypeStruct((1, c_pad), jnp.float32),
        ),
        grid=(num_tiles,),
        in_specs=[
            pl.BlockSpec((tile_m, k_pad), lambda i: (i, 0)),   # patches tile
            pl.BlockSpec((k_pad, c_pad), lambda i: (0, 0)),    # weights (resident)
        ],
        out_specs=(
            pl.BlockSpec((tile_m, c_pad), lambda i: (i, 0)),   # raw conv tile
            pl.BlockSpec((1, c_pad), lambda i: (0, 0)),        # sum   (accumulator)
            pl.BlockSpec((1, c_pad), lambda i: (0, 0)),        # sumsq (accumulator)
        ),
        compiler_params=pltpu.CompilerParams(
            dimension_semantics=("arbitrary",),                # stats accumulate over M
            vmem_limit_bytes=_VMEM_LIMIT),
    )(patches_p, w_p)

    # ---- Pass 2: normalize (folded scale/shift) + GELU, parallel over M tiles ----
    inv_m = 1.0 / float(m)   # global M, not tile or padded M
    out_p = pl.pallas_call(
        functools.partial(_bn_gelu_kernel, inv_m=inv_m, eps=eps),
        out_shape=jax.ShapeDtypeStruct((m_pad, c_pad), jnp.float32),
        grid=(num_tiles,),
        in_specs=[
            pl.BlockSpec((tile_m, c_pad), lambda i: (i, 0)),   # conv tile
            pl.BlockSpec((1, c_pad), lambda i: (0, 0)),        # sum
            pl.BlockSpec((1, c_pad), lambda i: (0, 0)),        # sumsq
            pl.BlockSpec((1, c_pad), lambda i: (0, 0)),        # gamma
            pl.BlockSpec((1, c_pad), lambda i: (0, 0)),        # beta
        ],
        out_specs=pl.BlockSpec((tile_m, c_pad), lambda i: (i, 0)),
        compiler_params=pltpu.CompilerParams(
            dimension_semantics=("parallel",),                 # shards across TCs on v7x
            vmem_limit_bytes=_VMEM_LIMIT),
    )(conv_out, ch_sum, ch_sumsq, g_row, bt_row)

    out_nhwc = out_p[:m, :cout].reshape(n, ho, wo, cout)
    return jnp.transpose(out_nhwc, (0, 3, 1, 2))


if __name__ == "__main__":
    in_channels, out_channels = 4, 8
    N, H, W = 2, 16, 16

    key = jax.random.PRNGKey(0)
    kx, kw_, kb, kg, kbt = jax.random.split(key, 5)

    x = jax.random.normal(kx, (N, in_channels, H, W), dtype=jnp.float32)
    weight = 0.1 * jax.random.normal(kw_, (out_channels, in_channels, 3, 3), dtype=jnp.float32)
    bias = 0.01 * jax.random.normal(kb, (out_channels,), dtype=jnp.float32)
    gamma = 1.0 + 0.1 * jax.random.normal(kg, (out_channels,), dtype=jnp.float32)
    beta = 0.05 * jax.random.normal(kbt, (out_channels,), dtype=jnp.float32)

    # tile_m=256 so the demo exercises the multi-tile stats-accumulation path (M = 512).
    out = cbr_forward(x, weight, bias, gamma, beta,
                      stride=1, padding=1, dilation=1, tile_m=256)
    out = jax.block_until_ready(out)

    assert out.shape == (N, out_channels, H, W), out.shape
    assert bool(jnp.all(jnp.isfinite(out)))
    assert float(jnp.min(out)) >= -0.2  # GELU lower bound ~= -0.17

    # Pure-JAX reference (same tanh-GELU variant as the kernel).
    conv_ref = lax.conv_general_dilated(
        x, weight, window_strides=(1, 1), padding=((1, 1), (1, 1)),
        dimension_numbers=("NCHW", "OIHW", "NCHW")) + bias[None, :, None, None]
    mu = jnp.mean(conv_ref, axis=(0, 2, 3), keepdims=True)
    var = jnp.var(conv_ref, axis=(0, 2, 3), keepdims=True)  # biased, as BN uses for normalization
    ref = (conv_ref - mu) * lax.rsqrt(var + BN_EPS) * gamma[None, :, None, None] \
        + beta[None, :, None, None]
    ref = jax.nn.gelu(ref, approximate=True)
    max_err = float(jnp.max(jnp.abs(out - ref)))
    assert max_err < 5e-2, max_err  # bf16 GEMM inputs, f32 accumulation

    print("KERNEL_OK")
</pallas_src>

<mosaic_0001>
module attributes {stable_mosaic.version = 11 : i64} {
  func.func @_conv_stats_kernel(%arg0: i32, %arg1: memref<256x128xbf16, #tpu.memory_space<vmem>>, %arg2: memref<128x128xbf16, #tpu.memory_space<vmem>>, %arg3: memref<256x128xf32, #tpu.memory_space<vmem>>, %arg4: memref<1x128xf32, #tpu.memory_space<vmem>>, %arg5: memref<1x128xf32, #tpu.memory_space<vmem>>) attributes {dimension_semantics = [#tpu.dimension_semantics<arbitrary>], iteration_bounds = array<i64: 2>, scalar_prefetch = 0 : i64, scratch_operands = 0 : i64, tpu.core_type = #tpu.core_type<tc>, window_params = [{transform_indices = @transform_0, window_bounds = array<i64: 256, 128>}, {pipeline_mode = #tpu.pipeline_mode<synchronous>, transform_indices = @transform_1, window_bounds = array<i64: 128, 128>}, {transform_indices = @transform_2, window_bounds = array<i64: 256, 128>}, {pipeline_mode = #tpu.pipeline_mode<synchronous>, transform_indices = @transform_3, window_bounds = array<i64: 1, 128>}, {pipeline_mode = #tpu.pipeline_mode<synchronous>, transform_indices = @transform_4, window_bounds = array<i64: 1, 128>}]} {
    %c0 = arith.constant 0 : index
    %c0_0 = arith.constant 0 : index
    %0 = vector.load %arg1[%c0, %c0_0] : memref<256x128xbf16, #tpu.memory_space<vmem>>, vector<256x128xbf16>
    %c0_1 = arith.constant 0 : index
    %c0_2 = arith.constant 0 : index
    %1 = vector.load %arg2[%c0_1, %c0_2] : memref<128x128xbf16, #tpu.memory_space<vmem>>, vector<128x128xbf16>
    %cst = arith.constant dense<0.000000e+00> : vector<256x128xf32>
    %2 = tpu.matmul %0, %1, %cst {dimension_numbers = #tpu.dot_dimension_numbers<[1], [0], [0], [1], [0, 0, 1, 1], [], []>} : vector<256x128xbf16>, vector<128x128xbf16>, vector<256x128xf32> -> vector<256x128xf32>
    %c0_3 = arith.constant 0 : index
    %c0_4 = arith.constant 0 : index
    %3 = vector.load %arg3[%c0_3, %c0_4] : memref<256x128xf32, #tpu.memory_space<vmem>>, vector<256x128xf32>
    tpu.vector_store %arg3[%c0_3, %c0_4], %2 {strides = array<i32>} : memref<256x128xf32, #tpu.memory_space<vmem>>, vector<256x128xf32>,
    %cst_5 = arith.constant 1.000000e+00 : f32
    %4 = vector.broadcast %cst_5 : f32 to vector<1x256xf32>
    %cst_6 = arith.constant dense<0.000000e+00> : vector<1x128xf32>
    %5 = tpu.matmul %4, %2, %cst_6 {dimension_numbers = #tpu.dot_dimension_numbers<[1], [0], [0], [1], [0, 0, 1, 1], [], []>} : vector<1x256xf32>, vector<256x128xf32>, vector<1x128xf32> -> vector<1x128xf32>
    %6 = arith.mulf %2, %2 : vector<256x128xf32>
    %cst_7 = arith.constant dense<0.000000e+00> : vector<1x128xf32>
    %7 = tpu.matmul %4, %6, %cst_7 {dimension_numbers = #tpu.dot_dimension_numbers<[1], [0], [0], [1], [0, 0, 1, 1], [], []>} : vector<1x256xf32>, vector<256x128xf32>, vector<1x128xf32> -> vector<1x128xf32>
    %c0_i32 = arith.constant 0 : i32
    %8 = arith.cmpi eq, %arg0, %c0_i32 : i32
    %9 = arith.extui %8 : i1 to i32
    %c0_i32_8 = arith.constant 0 : i32
    %10 = arith.cmpi ne, %9, %c0_i32_8 : i32
    scf.if %10 {
      %cst_17 = arith.constant 0.000000e+00 : f32
      %17 = vector.broadcast %cst_17 : f32 to vector<1x128xf32>
      %c0_18 = arith.constant 0 : index
      %c0_19 = arith.constant 0 : index
      %18 = vector.load %arg4[%c0_18, %c0_19] : memref<1x128xf32, #tpu.memory_space<vmem>>, vector<1x128xf32>
      tpu.vector_store %arg4[%c0_18, %c0_19], %17 {strides = array<i32>} : memref<1x128xf32, #tpu.memory_space<vmem>>, vector<1x128xf32>,
      %cst_20 = arith.constant 0.000000e+00 : f32
      %19 = vector.broadcast %cst_20 : f32 to vector<1x128xf32>
      %c0_21 = arith.constant 0 : index
      %c0_22 = arith.constant 0 : index
      %20 = vector.load %arg5[%c0_21, %c0_22] : memref<1x128xf32, #tpu.memory_space<vmem>>, vector<1x128xf32>
      tpu.vector_store %arg5[%c0_21, %c0_22], %19 {strides = array<i32>} : memref<1x128xf32, #tpu.memory_space<vmem>>, vector<1x128xf32>,
    } else {
    }
    %c0_9 = arith.constant 0 : index
    %c0_10 = arith.constant 0 : index
    %11 = vector.load %arg4[%c0_9, %c0_10] : memref<1x128xf32, #tpu.memory_space<vmem>>, vector<1x128xf32>
    %12 = arith.addf %11, %5 : vector<1x128xf32>
    %c0_11 = arith.constant 0 : index
    %c0_12 = arith.constant 0 : index
    %13 = vector.load %arg4[%c0_11, %c0_12] : memref<1x128xf32, #tpu.memory_space<vmem>>, vector<1x128xf32>
    tpu.vector_store %arg4[%c0_11, %c0_12], %12 {strides = array<i32>} : memref<1x128xf32, #tpu.memory_space<vmem>>, vector<1x128xf32>,
    %c0_13 = arith.constant 0 : index
    %c0_14 = arith.constant 0 : index
    %14 = vector.load %arg5[%c0_13, %c0_14] : memref<1x128xf32, #tpu.memory_space<vmem>>, vector<1x128xf32>
    %15 = arith.addf %14, %7 : vector<1x128xf32>
    %c0_15 = arith.constant 0 : index
    %c0_16 = arith.constant 0 : index
    %16 = vector.load %arg5[%c0_15, %c0_16] : memref<1x128xf32, #tpu.memory_space<vmem>>, vector<1x128xf32>
    tpu.vector_store %arg5[%c0_15, %c0_16], %15 {strides = array<i32>} : memref<1x128xf32, #tpu.memory_space<vmem>>, vector<1x128xf32>,
    return
  }
  func.func @transform_0(%arg0: i32) -> (i32, i32) {
    %c0_i32 = arith.constant 0 : i32
    %c0_i32_0 = arith.constant 0 : i32
    return %arg0, %c0_i32 : i32, i32
  }
  func.func @transform_1(%arg0: i32) -> (i32, i32) {
    %c0_i32 = arith.constant 0 : i32
    %c0_i32_0 = arith.constant 0 : i32
    %c0_i32_1 = arith.constant 0 : i32
    return %c0_i32, %c0_i32_0 : i32, i32
  }
  func.func @transform_2(%arg0: i32) -> (i32, i32) {
    %c0_i32 = arith.constant 0 : i32
    %c0_i32_0 = arith.constant 0 : i32
    return %arg0, %c0_i32 : i32, i32
  }
  func.func @transform_3(%arg0: i32) -> (i32, i32) {
    %c0_i32 = arith.constant 0 : i32
    %c0_i32_0 = arith.constant 0 : i32
    %c0_i32_1 = arith.constant 0 : i32
    return %c0_i32, %c0_i32_0 : i32, i32
  }
  func.func @transform_4(%arg0: i32) -> (i32, i32) {
    %c0_i32 = arith.constant 0 : i32
    %c0_i32_0 = arith.constant 0 : i32
    %c0_i32_1 = arith.constant 0 : i32
    return %c0_i32, %c0_i32_0 : i32, i32
  }
}

</mosaic_0001>

<bundles_post_ra>
// kernel: tpu_custom_call.1
= control target key start
LH: loop header
LB: loop body
LE: loop exit
PB: predicated region body
PF: predicated region fallthrough
CT: control target
= control target key end

     0   :  { %10 = vsyncpa [#allocation3], 0  ;;  %s2036_s0 = inlined_call_operand.hbm [shape: bf16[512,128], index: 0, kind: input, shape index: {}]   ;;  %s2037_s1 = inlined_call_operand.hbm [shape: bf16[128,128], index: 1, kind: input, shape index: {}]   ;;  %s2038_s2 = inlined_call_operand.hbm [shape: f32[512,128], index: 2, kind: output, shape index: {0}]   ;;  %s2039_s3 = inlined_call_operand.hbm [shape: f32[1,128], index: 3, kind: output, shape index: {1}]   ;;  %s2040_s4 = inlined_call_operand.hbm [shape: f32[1,128], index: 4, kind: output, shape index: {2}]  }
   0x1   :  { %12 = vsyncpa [#allocation3 + $0x1], 0 }
   0x2   :  { %13 = vsyncpa [#allocation6], 0 }
   0x3   :  { %14 = vsyncpa [#allocation4], 0 }
   0x4   :  { %16 = vsyncpa [#allocation4 + $0x1], 0 }
   0x5   :  { %17 = vsyncpa [#allocation9], 0  ;;  %s1515_s15 = smov 0   ;;  %s1517_s16 = smov 0  }
   0x6   :  { %s1519_s17 = smov 0   ;;  %s1521_s18 = smov 0  }
   0x7 LB: > { %s1536_s19 = sadd.s32 4294967295, %s1477_s18   ;;  %s939_s20 = sadd.s32 4294967294, %s1477_s18   ;;  %s1477_s18 = sphi %s1521_s18, %s2069_s18   ;;  %s1473_s17 = sphi %s1519_s17, %s2068_s17   ;;  %s1469_s16 = sphi %s1517_s16, %s2067_s16   ;;  %s1465_s15 = sphi %s1515_s15, %s2066_s15  }
   0x8   : > { %p43_p0 = scmp.ne.s32.totalorder %s1469_s16, %s1465_s15  ;;  %p2041_p1 = scmp.eq.s32.totalorder %s1536_s19, 0 }
   0x9   : > { %p94_p3 = scmp.eq.s32.totalorder %s939_s20, 1  ;;  %p940_p5 = scmp.ge.s32.totalorder %s1477_s18, 1 }
   0xa   : > { %p1545_p4 = por %p2041_p1, %p43_p0  ;;  %p143_p7 = scmp.lt.s32.totalorder %s1477_s18, 3 }
   0xb   : > { %p1550_p6 = por %p94_p3, %p43_p0  ;;  %s1479_s24 = smov [#allocation5]  }
   0xc   : > { %s2044_s21 = scalar_select %p1545_p4, 1, 0 }
   0xd   : > { %s2045_s22 = scalar_select %p1550_p6, 1, 0 }
   0xe   : > { %p1556_p9 = pnand %p940_p5, %p143_p7  ;;  %s155_s25 = sshll.u32 %s1479_s24, 4  ;;  %s1560_s25 = int_to_ptr.vmem [resolvable:$true] %s155_s25 }
   0xf   : > { %s1572_s27 = sadd.s32 1, %s1477_s18   ;;  %s30_s28 = sadd.s32 1, %s1473_s17 }
  0x10   : > { %s2046_s23 = scalar_select %p1556_p9, 1, 0 }
  0x11   : > { %p1208_p10 = pneg %p1556_p9  ;;  %s27_s29 = ssub.s32 %s1477_s18, %s1572_s27 }
  0x12   : > { %s1293_s6 = scalar_lea.hbm %s2037_s1, 1024 }
  0x13   : > { %p1567_p12 = pnand %p1208_p10, %p2041_p1  ;;  %p1294_p13 = scmp.ne.s32.totalorder %s2037_s1, %s1293_s6 }
  0x14   : > { %p1300_p7 = scmp.lt.u32.totalorder %s1293_s6, %s2037_s1 }
  0x15   : > { %p1295_p0 = pneg %p1567_p12 }
  0x17   : > { %p1296_p3 = pnand %p1295_p0, %p1294_p13 }
  0x19   : > { %p1297_p5 = pneg %p1296_p3 }
  0x1b   : > { %p1302_p10 = pnand %p1300_p7, %p1297_p5 }
  0x1d   : > { %1305 = shalt.err (!%p1302_p10)
}
  0x1e   : > { %s1306_s11 = scalar_lea.vmem %s1560_s25, 1024  ;;  %p1314_p2 = scmp.lt.s32.totalorder %s1560_s25, %s1560_s25 }
  0x1f   : > { %p1307_p11 = scmp.ne.s32.totalorder %s1560_s25, %s1306_s11  ;;  %p1315_p6 = scmp.lt.s32.totalorder %s1306_s11, %s1306_s11 }
  0x21   : > { %p1309_p8 = pnand %p1307_p11, %p1295_p0  ;;  %p1316_p4 = por %p1315_p6, %p1314_p2 }
  0x23   : > { %p1310_p1 = pneg %p1309_p8 }
  0x25   : > { %p1317_p9 = pnand %p1316_p4, %p1310_p1 }
  0x27   : > { %1320 = shalt.err (!%p1317_p9)
}
  0x28   : > { %s1480_s12 = smov 64   ;;  %s1481_s13 = smov 4  }
  0x29   : > { %1211 = dma.hbm_to_vmem [thread:$0]  (!%p1567_p12), %s2037_s1, 1024, %s1560_s25, [#allocation6], %s1480_s12, %s1480_s12, %s1481_s13  }
  0x2a   : > { %p28_p1 = scmp.eq.s32.totalorder %s27_s29, 0  ;;  %p37_p2 = scmp.ne.s32.totalorder %s1473_s17, %s1469_s16 }
  0x2b   : > { %p38_p4 = scmp.eq.s32.totalorder %s1477_s18, 0  ;;  %p1221_p6 = scmp.lt.s32.totalorder %s1477_s18, 2 }
  0x2c   : > { %s1606_s24 = scalar_select %p28_p1, %s1473_s17, %s30_s28  }
  0x2d   : > { %p39_p8 = por %p38_p4, %p37_p2  ;;  %p2048_p9 = scmp.eq.s32.totalorder %s1536_s19, 1 }
  0x2e   : > { %s169_s26 = sand.u32 1, %s1473_s17   ;;  %s984_s5 = sshll.u32 %s1477_s18, 11 }
  0x2f   : > { %p1610_p11 = por %p2048_p9, %p37_p2  ;;  %s943_s6 = sshll.u32 %s169_s26, 7 }
  0x30   : > { %s1619_s9 = scalar_lea.hbm %s2036_s0, %s984_s5  ;;  %s173_s25 = scalar_lea.vmem [#allocation2], %s943_s6 }
  0x31   : > { %s180_s28 = sshll.u32 %s173_s25, 4  ;;  %p1621_p12 = pnand %p1221_p6, %p39_p8  ;;  %s1625_s28 = int_to_ptr.vmem [resolvable:$true] %s180_s28 }
  0x32   : > { %s1627_s10 = scalar_lea.sflag [#allocation3], %s169_s26  ;;  %s1321_s11 = scalar_lea.hbm %s1619_s9, 2048 }
  0x33   : > { %p1322_p13 = scmp.ne.s32.totalorder %s1619_s9, %s1321_s11  ;;  %p1323_p0 = pneg %p1621_p12 }
  0x34   : > { %s1326_s5 = scalar_lea.hbm %s2036_s0, 4096  ;;  %p1327_p7 = scmp.lt.u32.totalorder %s1619_s9, %s2036_s0 }
  0x35   : > { %p1324_p3 = pnand %p1323_p0, %p1322_p13  ;;  %p1328_p10 = scmp.lt.u32.totalorder %s1326_s5, %s1321_s11 }
  0x36   : > { %p1330_p2 = scmp.lt.u32.totalorder %s1321_s11, %s1619_s9 }
  0x37   : > { %p1325_p5 = pneg %p1324_p3  ;;  %p1329_p1 = por %p1328_p10, %p1327_p7 }
  0x39   : > { %p1331_p4 = por %p1330_p2, %p1329_p1 }
  0x3b   : > { %p1332_p6 = pnand %p1331_p4, %p1325_p5 }
  0x3d   : > { %1335 = shalt.err (!%p1332_p6)
}
  0x3e   : > { %s1336_s26 = scalar_lea.vmem %s1625_s28, 2048  ;;  %s1482_s8 = smov [#allocation2]  }
  0x3f   : > { %p1337_p8 = scmp.ne.s32.totalorder %s1625_s28, %s1336_s26  ;;  %s1341_s25 = sshll.u32 %s1482_s8, 4  ;;  %s1342_s25 = int_to_ptr.vmem [resolvable:$false] %s1341_s25 }
  0x40   : > { %s1343_s14 = scalar_lea.vmem %s1342_s25, 4096  ;;  %p1344_p3 = scmp.lt.s32.totalorder %s1625_s28, %s1342_s25 }
  0x41   : > { %p1339_p9 = pnand %p1337_p8, %p1323_p0  ;;  %p1345_p7 = scmp.lt.s32.totalorder %s1343_s14, %s1336_s26 }
  0x43   : > { %p1340_p13 = pneg %p1339_p9  ;;  %p1346_p10 = por %p1345_p7, %p1344_p3 }
  0x45   : > { %p1347_p1 = pnand %p1346_p10, %p1340_p13 }
  0x47   : > { %1350 = shalt.err (!%p1347_p1)
}
  0x48   : > { %1215 = dma.hbm_to_vmem [thread:$0]  (!%p1621_p12), %s1619_s9, 2048, %s1625_s28, %s1627_s10, %s1480_s12, %s1480_s12, %s1481_s13  }
  0x49   : > { %p2051_p0 = scmp.ne.s32.totalorder %s2046_s23, 0 }
  0x4a   : > { %s1661_s11 = sand.u32 (!%p2051_p0), 1, %s1469_s16   ;;  %p2052_p5 = scmp.ne.s32.totalorder (!%p2051_p0), %s2044_s21, 0 }
  0x4b   : > { %192 = sbr.rel (%p2051_p0) target bundleno = 721 (0x2d1), region = 28  ;;  %s947_s20 = sshll.u32 (!%p2051_p0), %s1661_s11, 7 }
  0x4c   : > { %s195_s5 = scalar_lea.sflag (!%p2051_p0), [#allocation3], %s1661_s11  ;;  %s1665_s6 = scalar_lea.vmem (!%p2051_p0), [#allocation2], %s947_s20 }
  0x52   : > { %1448 = dma.done.wait (%p2052_p5), %s195_s5, 2048  }
  0x53   : > { %1450 = vsyncadd (%p2052_p5), %s195_s5, 4294965248  ;;  %p2053_p12 = scmp.eq.s32.totalorder %s1536_s19, 0 }
  0x55   : > { %1452 = dma.done.wait (%p2053_p12), [#allocation6], 1024   ;;  %p2054_p2 = pmov %p2053_p12 }
  0x56   : > { %v1269_v0 = vld [vmem:[#allocation5] sm:$0xff]   ;;  %v1270_v1 = vld [vmem:[#allocation5 + $0x8] sm:$0xff]   ;;  %v1271_v2 = vld [vmem:[#allocation5 + $0x10] sm:$0xff]   ;;  %v1483_v24 = vmov 1.0   ;;  %s949_s21 = sshll.u32 %s1661_s11, 8  ;;  %p2055_p4 = scmp.ne.s32.totalorder %s1536_s19, 0 }
  0x57   : > { %1454 = vsyncadd (%p2054_p2), [#allocation6], 4294966272  ;;  %1080 = vmatprep.subr.bf16.mxu0 %v1269_v0  ;;  %v1272_v3 = vld [vmem:[#allocation5 + $0x18] sm:$0xff]   ;;  %v1277_v4 = vld [vmem:[%s1665_s6] sm:$0xff]   ;;  %679 = vmatprep.mubr.f32.mxu1 %v1483_v24  ;;  %s1695_s23 = scalar_lea.vmem [#allocation7], %s949_s21 }
  0x58   : > { %1081 = vmatpush3.bf16.msra.mxu0 %v1269_v0  ;;  %1096 = vmatprep.mubr.bf16.mxu0 %v1277_v4  ;;  %v1273_v5 = vld [vmem:[#allocation5 + $0x20] sm:$0xff]   ;;  %v1274_v6 = vld [vmem:[#allocation5 + $0x28] sm:$0xff]   ;;  %v1275_v7 = vld [vmem:[#allocation5 + $0x30] sm:$0xff]  }
  0x59   : > { %1082 = vmatprep.subr.bf16.mxu0 %v1270_v1  ;;  %v1276_v8 = vld [vmem:[#allocation5 + $0x38] sm:$0xff]   ;;  %v1278_v9 = vld [vmem:[%s1665_s6 + $0x8] sm:$0xff]   ;;  %v1279_v10 = vld [vmem:[%s1665_s6 + $0x10] sm:$0xff]  }
  0x5a   : > { %v1280_v11 = vld [vmem:[%s1665_s6 + $0x18] sm:$0xff]   ;;  %v1281_v12 = vld [vmem:[%s1665_s6 + $0x20] sm:$0xff]   ;;  %v1282_v13 = vld [vmem:[%s1665_s6 + $0x28] sm:$0xff]  }
  0x5b   : > { %v1283_v14 = vld [vmem:[%s1665_s6 + $0x30] sm:$0xff]   ;;  %v1284_v15 = vld [vmem:[%s1665_s6 + $0x38] sm:$0xff]   ;;  %v1285_v16 = vld [vmem:[%s1665_s6 + $0x40] sm:$0xff]  }
  0x5c   : > { %1083 = vmatpush3.bf16.msra.mxu0 %v1270_v1  ;;  %v1286_v17 = vld [vmem:[%s1665_s6 + $0x48] sm:$0xff]   ;;  %v1287_v18 = vld [vmem:[%s1665_s6 + $0x50] sm:$0xff]   ;;  %v1288_v19 = vld [vmem:[%s1665_s6 + $0x58] sm:$0xff]  }
  0x5d   : > { %1084 = vmatprep.subr.bf16.mxu0 %v1271_v2  ;;  %v1289_v20 = vld [vmem:[%s1665_s6 + $0x60] sm:$0xff]   ;;  %v1290_v21 = vld [vmem:[%s1665_s6 + $0x68] sm:$0xff]   ;;  %v1291_v22 = vld [vmem:[%s1665_s6 + $0x70] sm:$0xff]  }
  0x5e   : > { %v1292_v23 = vld [vmem:[%s1665_s6 + $0x78] sm:$0xff]  }
  0x60   : > { %1085 = vmatpush3.bf16.msra.mxu0 %v1271_v2 }
  0x61   : > { %1086 = vmatprep.subr.bf16.mxu0 %v1272_v3 }
  0x64   : > { %1087 = vmatpush3.bf16.msra.mxu0 %v1272_v3 }
  0x65   : > { %1088 = vmatprep.subr.bf16.mxu0 %v1273_v5 }
  0x68   : > { %1089 = vmatpush3.bf16.msra.mxu0 %v1273_v5 }
  0x69   : > { %1090 = vmatprep.subr.bf16.mxu0 %v1274_v6 }
  0x6c   : > { %1091 = vmatpush3.bf16.msra.mxu0 %v1274_v6 }
  0x6d   : > { %1092 = vmatprep.subr.bf16.mxu0 %v1275_v7 }
  0x70   : > { %1093 = vmatpush3.bf16.msra.mxu0 %v1275_v7 }
  0x71   : > { %1094 = vmatprep.subr.bf16.mxu0 %v1276_v8 }
  0x74   : > { %1095 = vmatpush3.bf16.msra.mxu0 %v1276_v8 }
  0x77   : > { %1097 = vmatmul.mubr.bf16.vlgmr.msra.gmra.mrb[0].mxu0 %v1278_v9 }
  0x78   : > { %1100 = vmatprep.mubr.bf16.mxu0 %v1279_v10 }
  0x7f   : > { %1101 = vmatmul.mubr.bf16.gmra.mrb[4].mxu0 %v1280_v11 }
  0x80   : > { %1104 = vmatprep.mubr.bf16.mxu0 %v1281_v12 }
  0x87   : > { %1105 = vmatmul.mubr.bf16.gmra.mrb[8].mxu0 %v1282_v13 }
  0x88   : > { %1108 = vmatprep.mubr.bf16.mxu0 %v1283_v14 }
  0x8f   : > { %1109 = vmatmul.mubr.bf16.gmra.mrb[12].mxu0 %v1284_v15 }
  0x90   : > { %1112 = vmatprep.mubr.bf16.mxu0 %v1285_v16 }
  0x97   : > { %1113 = vmatmul.mubr.bf16.gmra.mrb[16].mxu0 %v1286_v17 }
  0x98   : > { %1116 = vmatprep.mubr.bf16.mxu0 %v1287_v18 }
  0x9f   : > { %1117 = vmatmul.mubr.bf16.gmra.mrb[20].mxu0 %v1288_v19 }
  0xa0   : > { %1120 = vmatprep.mubr.bf16.mxu0 %v1289_v20 }
  0xa7   : > { %1121 = vmatmul.mubr.bf16.gmra.mrb[24].mxu0 %v1290_v21 }
  0xa8   : > { %1124 = vmatprep.mubr.bf16.mxu0 %v1291_v22 }
  0xaf   : > { %1125 = vmatmul.mubr.bf16.gmra.mrb[28].mxu0 %v1292_v23 }
 0x14a   : > { %v1693_v25 = vpop.f32.mrb[0].mxu0 }
 0x14b   : > { %585 = vst [vmem:[%s1695_s23 + $0x10] sm:$0xff] %v1693_v25  ;;  %v1699_v26 = vpop.f32.mrb[1].mxu0  ;;  %v1707_v28 = vmul.f32 %v1693_v25, %v1693_v25 }
 0x14c   : > { %583 = vst [vmem:[%s1695_s23] sm:$0xff] %v1699_v26  ;;  %v1703_v27 = vpop.f32.mrb[2].mxu0  ;;  %v1721_v32 = vmul.f32 %v1699_v26, %v1699_v26 }
 0x14d   : > { %586 = vst [vmem:[%s1695_s23 + $0x18] sm:$0xff] %v1703_v27  ;;  %v1134_v29 = vpack.c.bf16 %v1703_v27, %v1693_v25  ;;  %v1715_v30 = vmul.f32 %v1703_v27, %v1703_v27  ;;  %v1717_v31 = vpop.f32.mrb[3].mxu0 }
 0x14e   : > { %584 = vst [vmem:[%s1695_s23 + $0x8] sm:$0xff] %v1717_v31  ;;  %v1727_v33 = vmul.f32 %v1717_v31, %v1717_v31  ;;  %v1130_v34 = vpack.c.bf16 %v1717_v31, %v1699_v26 }
 0x14f   : > { %v1166_v35 = vpack.c.bf16 %v1715_v30, %v1707_v28 }
 0x150   : > { %v1162_v36 = vpack.c.bf16 %v1727_v33, %v1721_v32 }
 0x152   : > { %v1735_v37 = vpop.f32.mrb[4].mxu0 }
 0x153   : > { %589 = vst [vmem:[%s1695_s23 + $0x30] sm:$0xff] %v1735_v37  ;;  %v1739_v38 = vpop.f32.mrb[5].mxu0  ;;  %v1747_v40 = vmul.f32 %v1735_v37, %v1735_v37 }
 0x154   : > { %587 = vst [vmem:[%s1695_s23 + $0x20] sm:$0xff] %v1739_v38  ;;  %v1743_v39 = vpop.f32.mrb[6].mxu0  ;;  %v1761_v44 = vmul.f32 %v1739_v38, %v1739_v38 }
 0x155   : > { %590 = vst [vmem:[%s1695_s23 + $0x38] sm:$0xff] %v1743_v39  ;;  %v1142_v41 = vpack.c.bf16 %v1743_v39, %v1735_v37  ;;  %v1755_v42 = vmul.f32 %v1743_v39, %v1743_v39  ;;  %v1757_v43 = vpop.f32.mrb[7].mxu0 }
 0x156   : > { %588 = vst [vmem:[%s1695_s23 + $0x28] sm:$0xff] %v1757_v43  ;;  %v1138_v45 = vpack.c.bf16 %v1757_v43, %v1739_v38  ;;  %v1769_v46 = vmul.f32 %v1757_v43, %v1757_v43 }
 0x157   : > { %v1174_v47 = vpack.c.bf16 %v1755_v42, %v1747_v40  ;;  %v1484_v40 = vmov (!%p2055_p4), 0.0  }
 0x158   : > { %v1170_v48 = vpack.c.bf16 %v1769_v46, %v1761_v44  ;;  %791 = vst [vmem:[#allocation8] sm:$0x1] (!%p2055_p4), %v1484_v40  ;;  %792 = vst [vmem:[#allocation10] sm:$0x1] (!%p2055_p4), %v1484_v40 }
 0x15a   : > { %v1775_v49 = vpop.f32.mrb[8].mxu0 }
 0x15b   : > { %593 = vst [vmem:[%s1695_s23 + $0x50] sm:$0xff] %v1775_v49  ;;  %v1779_v50 = vpop.f32.mrb[9].mxu0  ;;  %v1787_v52 = vmul.f32 %v1775_v49, %v1775_v49 }
 0x15c   : > { %591 = vst [vmem:[%s1695_s23 + $0x40] sm:$0xff] %v1779_v50  ;;  %v1783_v51 = vpop.f32.mrb[10].mxu0  ;;  %v1801_v56 = vmul.f32 %v1779_v50, %v1779_v50 }
 0x15d   : > { %594 = vst [vmem:[%s1695_s23 + $0x58] sm:$0xff] %v1783_v51  ;;  %v1150_v53 = vpack.c.bf16 %v1783_v51, %v1775_v49  ;;  %v1795_v54 = vmul.f32 %v1783_v51, %v1783_v51  ;;  %v1797_v55 = vpop.f32.mrb[11].mxu0 }
 0x15e   : > { %592 = vst [vmem:[%s1695_s23 + $0x48] sm:$0xff] %v1797_v55  ;;  %v1146_v57 = vpack.c.bf16 %v1797_v55, %v1779_v50  ;;  %v1809_v58 = vmul.f32 %v1797_v55, %v1797_v55 }
 0x15f   : > { %v1182_v59 = vpack.c.bf16 %v1795_v54, %v1787_v52 }
 0x160   : > { %v1178_v60 = vpack.c.bf16 %v1809_v58, %v1801_v56 }
 0x162   : > { %v1815_v61 = vpop.f32.mrb[12].mxu0 }
 0x163   : > { %597 = vst [vmem:[%s1695_s23 + $0x70] sm:$0xff] %v1815_v61  ;;  %v1819_v62 = vpop.f32.mrb[13].mxu0  ;;  %v1827_v0 = vmul.f32 %v1815_v61, %v1815_v61 }
 0x164   : > { %595 = vst [vmem:[%s1695_s23 + $0x60] sm:$0xff] %v1819_v62  ;;  %v1823_v63 = vpop.f32.mrb[14].mxu0  ;;  %v1841_v4 = vmul.f32 %v1819_v62, %v1819_v62 }
 0x165   : > { %598 = vst [vmem:[%s1695_s23 + $0x78] sm:$0xff] %v1823_v63  ;;  %v1158_v1 = vpack.c.bf16 %v1823_v63, %v1815_v61  ;;  %v1835_v2 = vmul.f32 %v1823_v63, %v1823_v63  ;;  %v1837_v3 = vpop.f32.mrb[15].mxu0 }
 0x166   : > { %596 = vst [vmem:[%s1695_s23 + $0x68] sm:$0xff] %v1837_v3  ;;  %v1154_v5 = vpack.c.bf16 %v1837_v3, %v1819_v62  ;;  %v1849_v6 = vmul.f32 %v1837_v3, %v1837_v3 }
 0x167   : > { %v1190_v7 = vpack.c.bf16 %v1835_v2, %v1827_v0 }
 0x168   : > { %v1186_v8 = vpack.c.bf16 %v1849_v6, %v1841_v4 }
 0x16a   : > { %v1114_v9 = vpop.f32.mrb[16].mxu0 }
 0x16b   : > { %601 = vst [vmem:[%s1695_s23 + $0x90] sm:$0xff] %v1114_v9  ;;  %v520_v10 = vpop.f32.mrb[17].mxu0  ;;  %v1857_v12 = vmul.f32 %v1114_v9, %v1114_v9 }
 0x16c   : > { %599 = vst [vmem:[%s1695_s23 + $0x80] sm:$0xff] %v520_v10  ;;  %v1115_v11 = vpop.f32.mrb[18].mxu0  ;;  %v1862_v16 = vmul.f32 %v520_v10, %v520_v10 }
 0x16d   : > { %602 = vst [vmem:[%s1695_s23 + $0x98] sm:$0xff] %v1115_v11  ;;  %v1132_v13 = vpack.c.bf16 %v1115_v11, %v1114_v9  ;;  %v1860_v14 = vmul.f32 %v1115_v11, %v1115_v11  ;;  %v523_v15 = vpop.f32.mrb[19].mxu0 }
 0x16e   : > { %600 = vst [vmem:[%s1695_s23 + $0x88] sm:$0xff] %v523_v15  ;;  %v1865_v17 = vmul.f32 %v523_v15, %v523_v15  ;;  %v1128_v18 = vpack.c.bf16 %v523_v15, %v520_v10 }
 0x16f   : > { %v1164_v19 = vpack.c.bf16 %v1860_v14, %v1857_v12 }
 0x170   : > { %1129 = vmatprep.subr.bf16.mxu1 %v1128_v18  ;;  %v1160_v20 = vpack.c.bf16 %v1865_v17, %v1862_v16 }
 0x171   : > { %1131 = vmatpush3.bf16.msra.mxu1 %v1130_v34 }
 0x172   : > { %v1118_v21 = vpop.f32.mrb[20].mxu0  ;;  %1133 = vmatprep.subr.bf16.mxu1 %v1132_v13 }
 0x173   : > { %605 = vst [vmem:[%s1695_s23 + $0xb0] sm:$0xff] %v1118_v21  ;;  %v536_v22 = vpop.f32.mrb[21].mxu0  ;;  %v1876_v9 = vmul.f32 %v1118_v21, %v1118_v21 }
 0x174   : > { %603 = vst [vmem:[%s1695_s23 + $0xa0] sm:$0xff] %v536_v22  ;;  %v1119_v23 = vpop.f32.mrb[22].mxu0  ;;  %v705_v26 = vmul.f32 %v536_v22, %v536_v22 }
 0x175   : > { %606 = vst [vmem:[%s1695_s23 + $0xb8] sm:$0xff] %v1119_v23  ;;  %v1140_v10 = vpack.c.bf16 %v1119_v23, %v1118_v21  ;;  %v708_v11 = vmul.f32 %v1119_v23, %v1119_v23  ;;  %v539_v15 = vpop.f32.mrb[23].mxu0  ;;  %1135 = vmatpush3.bf16.msra.mxu1 %v1134_v29 }
 0x176   : > { %604 = vst [vmem:[%s1695_s23 + $0xa8] sm:$0xff] %v539_v15  ;;  %v1136_v31 = vpack.c.bf16 %v539_v15, %v536_v22  ;;  %v706_v34 = vmul.f32 %v539_v15, %v539_v15 }
 0x177   : > { %v1172_v13 = vpack.c.bf16 %v708_v11, %v1876_v9 }
 0x178   : > { %1137 = vmatprep.subr.bf16.mxu1 %v1136_v31  ;;  %v1168_v18 = vpack.c.bf16 %v706_v34, %v705_v26 }
 0x179   : > { %1139 = vmatpush3.bf16.msra.mxu1 %v1138_v45 }
 0x17a   : > { %v1122_v21 = vpop.f32.mrb[24].mxu0  ;;  %1141 = vmatprep.subr.bf16.mxu1 %v1140_v10 }
 0x17b   : > { %609 = vst [vmem:[%s1695_s23 + $0xd0] sm:$0xff] %v1122_v21  ;;  %v552_v23 = vpop.f32.mrb[25].mxu0  ;;  %v711_v27 = vmul.f32 %v1122_v21, %v1122_v21 }
 0x17c   : > { %607 = vst [vmem:[%s1695_s23 + $0xc0] sm:$0xff] %v552_v23  ;;  %v1123_v25 = vpop.f32.mrb[26].mxu0  ;;  %v709_v38 = vmul.f32 %v552_v23, %v552_v23 }
 0x17d   : > { %610 = vst [vmem:[%s1695_s23 + $0xd8] sm:$0xff] %v1123_v25  ;;  %v1148_v29 = vpack.c.bf16 %v1123_v25, %v1122_v21  ;;  %v712_v22 = vmul.f32 %v1123_v25, %v1123_v25  ;;  %v555_v9 = vpop.f32.mrb[27].mxu0  ;;  %1143 = vmatpush3.bf16.msra.mxu1 %v1142_v41 }
 0x17e   : > { %608 = vst [vmem:[%s1695_s23 + $0xc8] sm:$0xff] %v555_v9  ;;  %v1144_v43 = vpack.c.bf16 %v555_v9, %v552_v23  ;;  %v710_v45 = vmul.f32 %v555_v9, %v555_v9 }
 0x17f   : > { %v1180_v10 = vpack.c.bf16 %v712_v22, %v711_v27 }
 0x180   : > { %1145 = vmatprep.subr.bf16.mxu1 %v1144_v43  ;;  %v1176_v11 = vpack.c.bf16 %v710_v45, %v709_v38 }
 0x181   : > { %1147 = vmatpush3.bf16.msra.mxu1 %v1146_v57 }
 0x182   : > { %v1126_v15 = vpop.f32.mrb[28].mxu0  ;;  %1149 = vmatprep.subr.bf16.mxu1 %v1148_v29 }
 0x183   : > { %613 = vst [vmem:[%s1695_s23 + $0xf0] sm:$0xff] %v1126_v15  ;;  %v568_v26 = vpop.f32.mrb[29].mxu0  ;;  %v715_v39 = vmul.f32 %v1126_v15, %v1126_v15 }
 0x184   : > { %611 = vst [vmem:[%s1695_s23 + $0xe0] sm:$0xff] %v568_v26  ;;  %v1127_v37 = vpop.f32.mrb[30].mxu0  ;;  %v713_v21 = vmul.f32 %v568_v26, %v568_v26 }
 0x185   : > { %614 = vst [vmem:[%s1695_s23 + $0xf8] sm:$0xff] %v1127_v37  ;;  %v1156_v41 = vpack.c.bf16 %v1127_v37, %v1126_v15  ;;  %v716_v31 = vmul.f32 %v1127_v37, %v1127_v37  ;;  %v571_v34 = vpop.f32.mrb[31].mxu0  ;;  %1151 = vmatpush3.bf16.msra.mxu1 %v1150_v53 }
 0x186   : > { %612 = vst [vmem:[%s1695_s23 + $0xe8] sm:$0xff] %v571_v34  ;;  %v1152_v23 = vpack.c.bf16 %v571_v34, %v568_v26  ;;  %v714_v50 = vmul.f32 %v571_v34, %v571_v34 }
 0x187   : > { %v1188_v55 = vpack.c.bf16 %v716_v31, %v715_v39 }
 0x188   : > { %v1184_v57 = vpack.c.bf16 %v714_v50, %v713_v21  ;;  %1153 = vmatprep.subr.bf16.mxu1 %v1152_v23 }
 0x189   : > { %1155 = vmatpush3.bf16.msra.mxu1 %v1154_v5 }
 0x18a   : > { %1157 = vmatprep.subr.bf16.mxu1 %v1156_v41 }
 0x18d   : > { %1159 = vmatpush3.bf16.msra.mxu1 %v1158_v1 }
 0x18e   : > { %1161 = vmatprep.subr.bf16.mxu1 %v1160_v20 }
 0x190   : > { %680 = vmatmul.mubr.f32.vlgmr.msra.gmra.mrb[0].mxu1 %v1483_v24 }
 0x191   : > { %1163 = vmatpush3.bf16.msra.mxu1 %v1162_v36  ;;  %781 = vmatprep.mubr.f32.mxu1 %v1483_v24 }
 0x192   : > { %1165 = vmatprep.subr.bf16.mxu1 %v1164_v19 }
 0x195   : > { %1167 = vmatpush3.bf16.msra.mxu1 %v1166_v35 }
 0x196   : > { %1169 = vmatprep.subr.bf16.mxu1 %v1168_v18 }
 0x199   : > { %1171 = vmatpush3.bf16.msra.mxu1 %v1170_v48 }
 0x19a   : > { %1173 = vmatprep.subr.bf16.mxu1 %v1172_v13 }
 0x19d   : > { %1175 = vmatpush3.bf16.msra.mxu1 %v1174_v47 }
 0x19e   : > { %1177 = vmatprep.subr.bf16.mxu1 %v1176_v11 }
 0x1a1   : > { %1179 = vmatpush3.bf16.msra.mxu1 %v1178_v60 }
 0x1a2   : > { %1181 = vmatprep.subr.bf16.mxu1 %v1180_v10 }
 0x1a5   : > { %1183 = vmatpush3.bf16.msra.mxu1 %v1182_v59 }
 0x1a6   : > { %1185 = vmatprep.subr.bf16.mxu1 %v1184_v57 }
 0x1a9   : > { %1187 = vmatpush3.bf16.msra.mxu1 %v1186_v8 }
 0x1aa   : > { %1189 = vmatprep.subr.bf16.mxu1 %v1188_v55 }
 0x1ad   : > { %1191 = vmatpush3.bf16.msra.mxu1 %v1190_v7 }
 0x1b0   : > { %782 = vmatmul.mubr.f32.vlgmr.msra.gmra.mrb[2].mxu1 %v1483_v24 }
 0x263   : > { %v1042_v28 = vpop.f32.mrb[0].mxu1 }
 0x264   : > { %v1043_v30 = vpop.f32.mrb[1].mxu1 }
 0x265   : > { %v1044_v32 = vadd.f32 %v1043_v30, %v1042_v28 }
 0x27f   : > { %790 = sbr.rel (%p2055_p4) target bundleno = 646 (0x286), region = 40 }
 0x283   : > { %v1077_v33 = vpop.f32.mrb[2].mxu1 }
 0x284   : > { %v1078_v35 = vpop.f32.mrb[3].mxu1 }
 0x285   : > { %v1079_v36 = vadd.f32 %v1078_v35, %v1077_v33 }
 0x286 PF: > { %v793_v42 = vld [vmem:[#allocation8] sm:$0x1]  ;;  %v796_v44 = vld [vmem:[#allocation10] sm:$0x1]  ;;  %s1485_s12 = smov [#allocation8]   ;;  %s985_s9 = sshll.u32 %s1536_s19, 12 }
 0x287   : > { %v794_v46 = vadd.f32 %v1044_v32, %v793_v42  ;;  %v797_v24 = vadd.f32 %v1079_v36, %v796_v44  ;;  %s827_s13 = sshll.u32 %s1485_s12, 4  ;;  %s1949_s10 = scalar_lea.hbm %s2038_s2, %s985_s9  ;;  %s828_s13 = int_to_ptr.vmem [resolvable:$true] %s827_s13 }
 0x288   : > { %s813_s7 = sshll.u32 %s1695_s23, 4  ;;  %s1351_s26 = scalar_lea.vmem %s828_s13, 16  ;;  %s1970_s7 = int_to_ptr.vmem [resolvable:$true] %s813_s7 }
 0x289   : > { %795 = vst [vmem:[#allocation8] sm:$0x1] %v794_v46  ;;  %798 = vst [vmem:[#allocation10] sm:$0x1] %v797_v24  ;;  %p1352_p6 = scmp.ne.s32.totalorder %s828_s13, %s1351_s26  ;;  %p2056_p8 = scmp.eq.s32.totalorder %s1536_s19, 1 }
 0x28a   : > { %s1357_s8 = scalar_lea.vmem %s828_s13, 32  ;;  %p1358_p3 = scmp.lt.s32.totalorder %s828_s13, %s828_s13 }
 0x28b   : > { %p1353_p9 = pnand %p1352_p6, %p2056_p8  ;;  %p1359_p7 = scmp.lt.s32.totalorder %s1357_s8, %s1351_s26 }
 0x28d   : > { %p1354_p13 = pneg %p1353_p9  ;;  %p1360_p10 = por %p1359_p7, %p1358_p3 }
 0x28f   : > { %p1361_p1 = pnand %p1360_p10, %p1354_p13 }
 0x291   : > { %1364 = shalt.err (!%p1361_p1)
}
 0x292   : > { %s1365_s20 = scalar_lea.hbm %s2039_s3, 16  ;;  %p2057_p5 = pmov %p2056_p8 }
 0x293   : > { %p1366_p0 = scmp.ne.s32.totalorder %s2039_s3, %s1365_s20  ;;  %p1371_p4 = scmp.lt.u32.totalorder %s1365_s20, %s2039_s3 }
 0x295   : > { %p1367_p12 = pnand %p1366_p0, %p2057_p5 }
 0x297   : > { %p1368_p2 = pneg %p1367_p12 }
 0x299   : > { %p1373_p6 = pnand %p1371_p4, %p1368_p2 }
 0x29b   : > { %1376 = shalt.err (!%p1373_p6)
}
 0x29c   : > { %p2058_p8 = pmov %p2057_p5  ;;  %s800_s28 = scalar_lea.sflag [#allocation4], %s1661_s11 }
 0x29d   : > { %s1377_s29 = scalar_lea.vmem %s1970_s7, 4096  ;;  %s1486_s26 = smov [#allocation7]  }
 0x29e   : > { %1200 = dma.vmem_to_hbm [thread:$0]  (%p2058_p8), %s828_s13, 16, %s2039_s3, [#allocation9]  }
 0x29f   : > { %p1378_p9 = scmp.ne.s32.totalorder %s1970_s7, %s1377_s29  ;;  %s1381_s8 = sshll.u32 %s1486_s26, 4  ;;  %s1382_s8 = int_to_ptr.vmem [resolvable:$false] %s1381_s8 }
 0x2a0   : > { %s1383_s25 = scalar_lea.vmem %s1382_s8, 8192  ;;  %p1384_p7 = scmp.lt.s32.totalorder %s1970_s7, %s1382_s8 }
 0x2a1   : > { %p1379_p13 = pnand %p1378_p9, %p1610_p11  ;;  %p1385_p10 = scmp.lt.s32.totalorder %s1383_s25, %s1377_s29 }
 0x2a3   : > { %p1380_p3 = pneg %p1379_p13  ;;  %p1386_p1 = por %p1385_p10, %p1384_p7 }
 0x2a5   : > { %p1387_p0 = pnand %p1386_p1, %p1380_p3 }
 0x2a7   : > { %1390 = shalt.err (!%p1387_p0)
}
 0x2a8   : > { %s1391_s13 = scalar_lea.hbm %s1949_s10, 4096  ;;  %s1395_s5 = scalar_lea.hbm %s2038_s2, 8192 }
 0x2a9   : > { %p1392_p5 = scmp.ne.s32.totalorder %s1949_s10, %s1391_s13  ;;  %p1396_p4 = scmp.lt.u32.totalorder %s1949_s10, %s2038_s2 }
 0x2aa   : > { %p1397_p6 = scmp.lt.u32.totalorder %s1395_s5, %s1391_s13  ;;  %p1399_p9 = scmp.lt.u32.totalorder %s1391_s13, %s1949_s10 }
 0x2ab   : > { %p1393_p12 = pnand %p1392_p5, %p1610_p11 }
 0x2ac   : > { %p1398_p8 = por %p1397_p6, %p1396_p4 }
 0x2ad   : > { %p1394_p2 = pneg %p1393_p12 }
 0x2ae   : > { %p1400_p13 = por %p1399_p9, %p1398_p8 }
 0x2b0   : > { %p1401_p3 = pnand %p1400_p13, %p1394_p2 }
 0x2b2   : > { %1404 = shalt.err (!%p1401_p3)
}
 0x2b3   : > { %s1487_s23 = smov 128   ;;  %s1488_s12 = smov 8  }
 0x2b4   : > { %1198 = dma.vmem_to_hbm [thread:$0]  (%p1610_p11), %s1970_s7, 4096, %s1949_s10, %s800_s28, %s1487_s23, %s1487_s23, %s1488_s12  }
 0x2b5   : > { %s1489_s9 = smov [#allocation10]   ;;  %p2059_p10 = scmp.eq.s32.totalorder %s1536_s19, 1 }
 0x2b6   : > { %s838_s29 = sshll.u32 %s1489_s9, 4  ;;  %s839_s29 = int_to_ptr.vmem [resolvable:$true] %s838_s29 }
 0x2b7   : > { %s1405_s26 = scalar_lea.vmem %s839_s29, 16  ;;  %s1411_s8 = scalar_lea.vmem %s839_s29, 32 }
 0x2b8   : > { %p1406_p7 = scmp.ne.s32.totalorder %s839_s29, %s1405_s26  ;;  %p1412_p5 = scmp.lt.s32.totalorder %s839_s29, %s839_s29 }
 0x2b9   : > { %p1413_p12 = scmp.lt.s32.totalorder %s1411_s8, %s1405_s26 }
 0x2ba   : > { %p1407_p1 = pnand %p1406_p7, %p2059_p10 }
 0x2bb   : > { %p1414_p2 = por %p1413_p12, %p1412_p5 }
 0x2bc   : > { %p1408_p0 = pneg %p1407_p1 }
 0x2be   : > { %p1415_p4 = pnand %p1414_p2, %p1408_p0 }
 0x2c0   : > { %1418 = shalt.err (!%p1415_p4)
}
 0x2c1   : > { %s1419_s30 = scalar_lea.hbm %s2040_s4, 16  ;;  %p2060_p6 = pmov %p2059_p10 }
 0x2c2   : > { %p1420_p11 = scmp.ne.s32.totalorder %s2040_s4, %s1419_s30  ;;  %p1425_p13 = scmp.lt.u32.totalorder %s1419_s30, %s2040_s4 }
 0x2c4   : > { %p1421_p8 = pnand %p1420_p11, %p2060_p6 }
 0x2c6   : > { %p1422_p9 = pneg %p1421_p8 }
 0x2c8   : > { %p1427_p3 = pnand %p1425_p13, %p1422_p9 }
 0x2ca   : > { %1430 = shalt.err (!%p1427_p3)
}
 0x2cb   : > { %p2061_p7 = pmov %p2060_p6  ;;  %p2062_p10 = pmov %p2060_p6 }
 0x2cd   : > { %1202 = dma.vmem_to_hbm [thread:$0]  (%p2061_p7), %s839_s29, 16, %s2040_s4, [#allocation9]  }
 0x2ce   : > { %1456 = dma.done.wait (%p2062_p10), [#allocation9], 32   ;;  %p2063_p1 = pmov %p2060_p6 }
 0x2d0   : > { %1458 = vsyncadd (%p2063_p1), [#allocation9], 4294967264 }
 0x2d1 PF: > { %s858_s5 = sand.u32 1, %s1465_s15   ;;  %p2064_p0 = scmp.ne.s32.totalorder %s2045_s22, 0 }
 0x2d2   : > { %p2065_p5 = scmp.ge.s32.totalorder %s1477_s18, 2  ;;  %s859_s6 = scalar_lea.sflag [#allocation4], %s858_s5 }
 0x2d4   : > { %p1217_p12 = pnand %p2065_p5, %p2064_p0 }
 0x2d6   : > { %1460 = dma.done.wait (!%p1217_p12), %s859_s6, 4096  }
 0x2d7   : > { %1462 = vsyncadd (!%p1217_p12), %s859_s6, 4294963200  ;;  %p20_p2 = scmp.ge.s32.totalorder %s1572_s27, 4   ;;  %s2066_s15 = smov %s1469_s16 }
 0x2d8   : > { %s2067_s16 = smov %s1473_s17  ;;  %s2068_s17 = smov %s1606_s24 }
 0x2d9   : > { %s2069_s18 = smov %s1572_s27  ;;  %22 = sbr.rel (!%p20_p2) target bundleno = 7 (0x7), region = 97 }
 0x2e0   :  { %864 = vsyncpa [#allocation3], 1 }
 0x2e1   :  { %866 = vsyncpa [#allocation3 + $0x1], 1 }
 0x2e2   :  { %867 = vsyncpa [#allocation6], 1 }
 0x2e3   :  { %868 = vsyncpa [#allocation4], 1 }
 0x2e4   :  { %870 = vsyncpa [#allocation4 + $0x1], 1 }
 0x2e5   :  { %871 = vsyncpa [#allocation9], 1 }

</bundles_post_ra>
